<compile_context>
chip_gen: v7x
topology: tpu7x:2x2x1
jax: 0.10.0
libtpu: 0.0.40
codegen_flags: <defaults>
</compile_context>

<pallas_src>
import functools

import jax
import jax.numpy as jnp
from jax import lax
from jax.experimental import pallas as pl
from jax.experimental.pallas import tpu as pltpu


def _round_up(x, m):
    return (x + m - 1) // m * m


# Conservative per-kernel VMEM budget that leaves headroom on every
# generation (v5e 16 MiB scoped default / v7x 64 MiB physical).
_VMEM_BUDGET = 20 * 1024 * 1024


def _tile_cost_bytes(tile, E, D, B_pad):
    """Approximate VMEM footprint for a given entity tile (double-buffered)."""
    ent = 2 * tile * D * 2                # entity tile, bf16, 2 buffers
    out = 2 * B_pad * tile * 4            # output tile, f32, 2 buffers
    resid = 2 * 2 * B_pad * D * 2         # sub/rel resident, bf16, 2 buffers each
    bias = 2 * _round_up(E, tile) * 4     # resident bias, f32
    return ent + out + resid + bias


def _choose_tile_e(requested, E, D, B_pad):
    tile = min(_round_up(requested, 128), _round_up(E, 128))
    tile = max(tile, 128)
    while tile > 128 and _tile_cost_bytes(tile, E, D, B_pad) > _VMEM_BUDGET:
        tile -= 128
    return tile


def distmult_kernel(sub_ref, rel_ref, ent_ref, bias_ref, out_ref, *,
                    apply_sigmoid):
    # sub_ref, rel_ref: (B, D) bf16   ent_ref: (TE, D) bf16
    # bias_ref: (n_tiles, TE) f32 (fully resident)   out_ref: (B, TE) f32
    j = pl.program_id(0)

    obj = sub_ref[...] * rel_ref[...]                       # (B, D)  VPU, bf16

    # Contract last dims of both operands -> MXU consumes ent tile in its
    # stored layout (no XLU transpose), f32 accumulation.
    logits = lax.dot_general(
        obj, ent_ref[...],
        dimension_numbers=(((1,), (1,)), ((), ())),
        preferred_element_type=jnp.float32)                 # (B, TE)

    logits = logits + bias_ref[j]                           # (TE,) broadcast
    if apply_sigmoid:
        out_ref[...] = jax.nn.sigmoid(logits)
    else:
        out_ref[...] = logits


@functools.partial(jax.jit, static_argnames=("tile_e", "apply_sigmoid"))
def distmult_score(sub_emb, rel_emb, all_ent, bias, *, tile_e=1024,
                   apply_sigmoid=True):
    B, D = sub_emb.shape
    E, _ = all_ent.shape

    # Pad batch to the bf16 sublane pack (16 rows) for clean vreg layout.
    B_pad = _round_up(max(B, 1), 16)
    tile = _choose_tile_e(tile_e, E, D, B_pad)
    E_pad = _round_up(E, tile)
    n_tiles = E_pad // tile

    # bf16 streaming of the dominant HBM traffic; padded rows are zeros and
    # their scores are sliced off below.
    sub_p = jnp.zeros((B_pad, D), jnp.bfloat16).at[:B].set(
        sub_emb.astype(jnp.bfloat16))
    rel_p = jnp.zeros((B_pad, D), jnp.bfloat16).at[:B].set(
        rel_emb.astype(jnp.bfloat16))
    ent_p = jnp.zeros((E_pad, D), jnp.bfloat16).at[:E].set(
        all_ent.astype(jnp.bfloat16))
    bias_p = jnp.zeros((E_pad,), jnp.float32).at[:E].set(
        bias.astype(jnp.float32)).reshape(n_tiles, tile)

    need = _tile_cost_bytes(tile, E, D, B_pad)
    vmem_limit = int(min(48 * 1024 * 1024, max(2 * need, 8 * 1024 * 1024)))

    cost = pl.CostEstimate(
        flops=2 * B_pad * D * E_pad,
        transcendentals=(B_pad * E_pad) if apply_sigmoid else 0,
        bytes_accessed=(E_pad * D * 2 + 2 * B_pad * D * 2
                        + E_pad * 4 + B_pad * E_pad * 4),
    )

    out = pl.pallas_call(
        functools.partial(distmult_kernel, apply_sigmoid=apply_sigmoid),
        out_shape=jax.ShapeDtypeStruct((B_pad, E_pad), jnp.float32),
        grid_spec=pltpu.PrefetchScalarGridSpec(
            num_scalar_prefetch=0,
            grid=(n_tiles,),
            in_specs=[
                pl.BlockSpec((B_pad, D), lambda j: (0, 0)),       # sub (resident)
                pl.BlockSpec((B_pad, D), lambda j: (0, 0)),       # rel (resident)
                pl.BlockSpec((tile, D), lambda j: (j, 0)),        # entity tile
                pl.BlockSpec((n_tiles, tile), lambda j: (0, 0)),  # bias (resident)
            ],
            out_specs=pl.BlockSpec((B_pad, tile), lambda j: (0, j)),
        ),
        compiler_params=pltpu.CompilerParams(
            dimension_semantics=("parallel",),
            vmem_limit_bytes=vmem_limit),
        cost_estimate=cost,
    )(sub_p, rel_p, ent_p, bias_p)

    return out[:B, :E]


def xavier_normal(key, shape, dtype=jnp.float32):
    # torch.nn.init.xavier_normal_ convention for 2-D weights:
    # fan_out = shape[0], fan_in = shape[1].
    fan_out, fan_in = shape[0], shape[1]
    std = (2.0 / (fan_in + fan_out)) ** 0.5
    return std * jax.random.normal(key, shape, dtype)


def distmult_forward(params, sub, rel):
    """Eval-mode DistMult.forward (x_ops='', r_ops='' -> exop is identity)."""
    x = params["init_embed"]          # (E, D)
    r = params["init_rel"]            # (R, D)
    x_h = x_t = x                     # exop identity
    sub_emb = x_h[sub]                # index_select dim 0 (plain-JAX gather)
    rel_emb = r[rel]
    return distmult_score(sub_emb, rel_emb, x_t, params["bias"])
    # TODO(synk): training-mode BCE loss path not implemented (eval returns score).


def reference_forward(params, sub, rel):
    """Full-f32 reference (matches the PyTorch module numerics)."""
    sub_emb = params["init_embed"][sub]
    rel_emb = params["init_rel"][rel]
    obj = sub_emb * rel_emb
    x = obj @ params["init_embed"].T + params["bias"][None, :]
    return jax.nn.sigmoid(x)


def reference_forward_bf16(params, sub, rel):
    """Reference that mirrors the kernel's bf16-stream / f32-accumulate path."""
    sub_emb = params["init_embed"][sub].astype(jnp.bfloat16)
    rel_emb = params["init_rel"][rel].astype(jnp.bfloat16)
    ent = params["init_embed"].astype(jnp.bfloat16)
    obj = sub_emb * rel_emb
    logits = lax.dot_general(obj, ent,
                             dimension_numbers=(((1,), (1,)), ((), ())),
                             preferred_element_type=jnp.float32)
    return jax.nn.sigmoid(logits + params["bias"][None, :])


if __name__ == "__main__":
    num_ents, num_rels, init_dim = 256, 16, 128
    batch = 8

    key = jax.random.PRNGKey(0)
    k_e, k_r, k_s, k_rel = jax.random.split(key, 4)

    params = {
        "init_embed": xavier_normal(k_e, (num_ents, init_dim)),
        "init_rel": xavier_normal(k_r, (num_rels, init_dim)),
        "bias": jnp.zeros((num_ents,), jnp.float32),
    }

    sub = jax.random.randint(k_s, (batch,), 0, num_ents, dtype=jnp.int32)
    rel = jax.random.randint(k_rel, (batch,), 0, num_rels, dtype=jnp.int32)

    score = distmult_forward(params, sub, rel)
    score = jax.block_until_ready(score)

    assert score.shape == (batch, num_ents)

    ref_bf = reference_forward_bf16(params, sub, rel)
    ref_f32 = reference_forward(params, sub, rel)
    assert jnp.allclose(score, ref_bf, atol=2e-3, rtol=2e-3), "bf16-matched ref mismatch"
    assert jnp.allclose(score, ref_f32, atol=3e-2, rtol=3e-2), "f32 ref mismatch"

    print("KERNEL_OK")
</pallas_src>

<mosaic_0001>
module attributes {stable_mosaic.version = 11 : i64} {
  func.func @distmult_kernel(%arg0: i32, %arg1: memref<16x128xbf16, #tpu.memory_space<vmem>>, %arg2: memref<16x128xbf16, #tpu.memory_space<vmem>>, %arg3: memref<256x128xbf16, #tpu.memory_space<vmem>>, %arg4: memref<1x256xf32, #tpu.memory_space<vmem>>, %arg5: memref<16x256xf32, #tpu.memory_space<vmem>>) attributes {dimension_semantics = [#tpu.dimension_semantics<parallel>], iteration_bounds = array<i64: 1>, scalar_prefetch = 0 : i64, scratch_operands = 0 : i64, tpu.core_type = #tpu.core_type<tc>, window_params = [{pipeline_mode = #tpu.pipeline_mode<synchronous>, transform_indices = @transform_0, window_bounds = array<i64: 16, 128>}, {pipeline_mode = #tpu.pipeline_mode<synchronous>, transform_indices = @transform_1, window_bounds = array<i64: 16, 128>}, {transform_indices = @transform_2, window_bounds = array<i64: 256, 128>}, {pipeline_mode = #tpu.pipeline_mode<synchronous>, transform_indices = @transform_3, window_bounds = array<i64: 1, 256>}, {transform_indices = @transform_4, window_bounds = array<i64: 16, 256>}]} {
    %c0 = arith.constant 0 : index
    %c0_0 = arith.constant 0 : index
    %0 = vector.load %arg1[%c0, %c0_0] : memref<16x128xbf16, #tpu.memory_space<vmem>>, vector<16x128xbf16>
    %c0_1 = arith.constant 0 : index
    %c0_2 = arith.constant 0 : index
    %1 = vector.load %arg2[%c0_1, %c0_2] : memref<16x128xbf16, #tpu.memory_space<vmem>>, vector<16x128xbf16>
    %2 = arith.mulf %0, %1 : vector<16x128xbf16>
    %c0_3 = arith.constant 0 : index
    %c0_4 = arith.constant 0 : index
    %3 = vector.load %arg3[%c0_3, %c0_4] : memref<256x128xbf16, #tpu.memory_space<vmem>>, vector<256x128xbf16>
    %cst = arith.constant dense<0.000000e+00> : vector<16x256xf32>
    %4 = tpu.matmul %2, %3, %cst {dimension_numbers = #tpu.dot_dimension_numbers<[1], [1], [0], [0], [0, 0, 1, 0], [], []>} : vector<16x128xbf16>, vector<256x128xbf16>, vector<16x256xf32> -> vector<16x256xf32>
    %5 = arith.index_cast %arg0 : i32 to index
    %c0_5 = arith.constant 0 : index
    %6 = vector.load %arg4[%5, %c0_5] : memref<1x256xf32, #tpu.memory_space<vmem>>, vector<1x256xf32>
    %7 = vector.shape_cast %6 : vector<1x256xf32> to vector<256xf32>
    %8 = vector.shape_cast %7 : vector<256xf32> to vector<1x256xf32>
    %9 = vector.broadcast %8 : vector<1x256xf32> to vector<16x256xf32>
    %10 = arith.addf %4, %9 : vector<16x256xf32>
    %11 = arith.negf %10 : vector<16x256xf32>
    %12 = math.exp %11 : vector<16x256xf32>
    %cst_6 = arith.constant 1.000000e+00 : f32
    %13 = vector.broadcast %cst_6 : f32 to vector<16x256xf32>
    %14 = arith.addf %13, %12 : vector<16x256xf32>
    %15 = arith.divf %13, %14 : vector<16x256xf32>
    %c0_7 = arith.constant 0 : index
    %c0_8 = arith.constant 0 : index
    %16 = vector.load %arg5[%c0_7, %c0_8] : memref<16x256xf32, #tpu.memory_space<vmem>>, vector<16x256xf32>
    tpu.vector_store %arg5[%c0_7, %c0_8], %15 {strides = array<i32>} : memref<16x256xf32, #tpu.memory_space<vmem>>, vector<16x256xf32>,
    return
  }
  func.func @transform_0(%arg0: i32) -> (i32, i32) {
    %c0_i32 = arith.constant 0 : i32
    %c0_i32_0 = arith.constant 0 : i32
    %c0_i32_1 = arith.constant 0 : i32
    return %c0_i32, %c0_i32_0 : i32, i32
  }
  func.func @transform_1(%arg0: i32) -> (i32, i32) {
    %c0_i32 = arith.constant 0 : i32
    %c0_i32_0 = arith.constant 0 : i32
    %c0_i32_1 = arith.constant 0 : i32
    return %c0_i32, %c0_i32_0 : i32, i32
  }
  func.func @transform_2(%arg0: i32) -> (i32, i32) {
    %c0_i32 = arith.constant 0 : i32
    %c0_i32_0 = arith.constant 0 : i32
    return %arg0, %c0_i32 : i32, i32
  }
  func.func @transform_3(%arg0: i32) -> (i32, i32) {
    %c0_i32 = arith.constant 0 : i32
    %c0_i32_0 = arith.constant 0 : i32
    %c0_i32_1 = arith.constant 0 : i32
    return %c0_i32, %c0_i32_0 : i32, i32
  }
  func.func @transform_4(%arg0: i32) -> (i32, i32) {
    %c0_i32 = arith.constant 0 : i32
    %c0_i32_0 = arith.constant 0 : i32
    return %c0_i32, %arg0 : i32, i32
  }
}

</mosaic_0001>

<bundles_post_ra>
// kernel: distmult_score.1
= control target key start
LH: loop header
LB: loop body
LE: loop exit
PB: predicated region body
PF: predicated region fallthrough
CT: control target
= control target key end

     0   :  { %v60_v23 = vlaneseq  ;;  %s418_s2 = inlined_call_operand.vmem [shape: bf16[256,128], index: 2, kind: input, shape index: {}]   ;;  %s419_s0 = inlined_call_operand.vmem [shape: bf16[16,128], index: 0, kind: input, shape index: {}]   ;;  %s420_s1 = inlined_call_operand.vmem [shape: bf16[16,128], index: 1, kind: input, shape index: {}]   ;;  %s421_s3 = inlined_call_operand.vmem [shape: f32[1,256], index: 3, kind: input, shape index: {}]   ;;  %s422_s4 = inlined_call_operand.vmem [shape: f32[16,256], index: 4, kind: output, shape index: {}]  }
   0x1   :  { %v286_v0 = vld [vmem:[%s418_s2 + $0x40] sm:$0xff]   ;;  %v288_v2 = vld [vmem:[%s418_s2 + $0x48] sm:$0xff]   ;;  %v290_v4 = vld [vmem:[%s418_s2 + $0x50] sm:$0xff]  }
   0x2   :  { %v287_v1 = vld [vmem:[%s418_s2] sm:$0xff]   ;;  %268 = vmatprep.subr.bf16.mxu0 %v286_v0  ;;  %v289_v3 = vld [vmem:[%s418_s2 + $0x8] sm:$0xff]   ;;  %v291_v5 = vld [vmem:[%s418_s2 + $0x10] sm:$0xff]   ;;  %v61_v24 = vshrl.u32 %v60_v23, 7 }
   0x3   :  { %269 = vmatpush3.bf16.xpose.msra.mxu0 %v287_v1  ;;  %v292_v6 = vld [vmem:[%s418_s2 + $0x58] sm:$0xff]   ;;  %v18_v7 = vld [vmem:[%s419_s0] sm:$0xf]  ;;  %v19_v8 = vld [vmem:[%s419_s0 + $0x4] sm:$0xf] }
   0x4   :  { %270 = vmatprep.subr.bf16.mxu0 %v288_v2  ;;  %v20_v9 = vld [vmem:[%s420_s1] sm:$0xf]  ;;  %v21_v10 = vld [vmem:[%s420_s1 + $0x4] sm:$0xf]  ;;  %v293_v14 = vld [vmem:[%s418_s2 + $0x18] sm:$0xff]   ;;  %v62_v25 = vsub.s32 0, %v61_v24 }
   0x5   :  { %v22_v11 = vmul.bf16 %v20_v9, %v18_v7  ;;  %v23_v12 = vmul.bf16 %v21_v10, %v19_v8  ;;  %v294_v15 = vld [vmem:[%s418_s2 + $0x60] sm:$0xff]   ;;  %v296_v17 = vld [vmem:[%s418_s2 + $0x68] sm:$0xff]   ;;  %v298_v19 = vld [vmem:[%s418_s2 + $0x70] sm:$0xff]   ;;  %v66_v27 = vsub.s32 1, %v61_v24 }
   0x6   :  { %v295_v16 = vld [vmem:[%s418_s2 + $0x20] sm:$0xff]   ;;  %v297_v18 = vld [vmem:[%s418_s2 + $0x28] sm:$0xff]   ;;  %v299_v20 = vld [vmem:[%s418_s2 + $0x30] sm:$0xff]  }
   0x7   :  { %v247_v13 = vcombine.low %v22_v11, %v23_v12  ;;  %v300_v21 = vld [vmem:[%s418_s2 + $0x78] sm:$0xff]   ;;  %v58_v26 = vld [vmem:[%s421_s3] sm:$0x3] }
   0x8   :  { %v301_v22 = vld [vmem:[%s418_s2 + $0x38] sm:$0xff]   ;;  %v63_v28 = vrot.slane %v58_v26, %v62_v25  ;;  %v67_v29 = vrot.slane %v58_v26, %v66_v27 }
   0x9   :  { %284 = vmatprep.mubr.bf16.mxu0 %v247_v13 }
   0xb   :  { %271 = vmatpush3.bf16.xpose.msra.mxu0 %v289_v3 }
   0xc   :  { %272 = vmatprep.subr.bf16.mxu0 %v290_v4 }
  0x13   :  { %273 = vmatpush3.bf16.xpose.msra.mxu0 %v291_v5 }
  0x14   :  { %274 = vmatprep.subr.bf16.mxu0 %v292_v6 }
  0x1b   :  { %275 = vmatpush3.bf16.xpose.msra.mxu0 %v293_v14 }
  0x1c   :  { %276 = vmatprep.subr.bf16.mxu0 %v294_v15 }
  0x23   :  { %277 = vmatpush3.bf16.xpose.msra.mxu0 %v295_v16 }
  0x24   :  { %278 = vmatprep.subr.bf16.mxu0 %v296_v17 }
  0x2b   :  { %279 = vmatpush3.bf16.xpose.msra.mxu0 %v297_v18 }
  0x2c   :  { %280 = vmatprep.subr.bf16.mxu0 %v298_v19 }
  0x33   :  { %281 = vmatpush3.bf16.xpose.msra.mxu0 %v299_v20 }
  0x34   :  { %282 = vmatprep.subr.bf16.mxu0 %v300_v21 }
  0x3b   :  { %283 = vmatpush3.bf16.xpose.msra.mxu0 %v301_v22 }
  0x42   :  { %285 = vmatmul.mubr.bf16.vlgmr.msra.gmra.mrb[0].mxu0 %v247_v13 }
 0x115   :  { %v206_v30 = vpop.f32.mrb[0].mxu0 }
 0x116   :  { %v207_v31 = vadd.f32 %v206_v30, %v63_v28  ;;  %v208_v32 = vpop.f32.mrb[1].mxu0 }
 0x117   :  { %v209_v33 = vadd.f32 %v208_v32, %v67_v29  ;;  %v210_v34 = vpop.f32.mrb[2].mxu0 }
 0x118   :  { %v264_v35 = vmul.f32 -1.442695, %v207_v31  ;;  %v211_v36 = vadd.f32 %v210_v34, %v63_v28  ;;  %v212_v37 = vpop.f32.mrb[3].mxu0 }
 0x119   :  { %v265_v38 = vmul.f32 -1.442695, %v209_v33  ;;  %v213_v39 = vadd.f32 %v212_v37, %v67_v29 }
 0x11a   :  { %302 = vpow2.f32 %v264_v35  ;;  %v266_v40 = vmul.f32 -1.442695, %v211_v36 }
 0x11b   :  { %304 = vpow2.f32 %v265_v38  ;;  %v267_v41 = vmul.f32 -1.442695, %v213_v39 }
 0x11c   :  { %306 = vpow2.f32 %v266_v40 }
 0x11d   :  { %308 = vpow2.f32 %v267_v41 }
 0x124   :  { %v303_v42 = vpop.eup %302 }
 0x125   :  { %v305_v43 = vpop.eup %304  ;;  %v227_v44 = vadd.f32 1.0, %v303_v42 }
 0x126   :  { %v307_v45 = vpop.eup %306  ;;  %v228_v46 = vadd.f32 1.0, %v305_v43 }
 0x127   :  { %v309_v47 = vpop.eup %308  ;;  %310 = vrcp.f32 %v227_v44  ;;  %v229_v48 = vadd.f32 1.0, %v307_v45 }
 0x128   :  { %312 = vrcp.f32 %v228_v46  ;;  %v230_v49 = vadd.f32 1.0, %v309_v47 }
 0x129   :  { %314 = vrcp.f32 %v229_v48 }
 0x12a   :  { %316 = vrcp.f32 %v230_v49 }
 0x131   :  { %v311_v50 = vpop.eup %310 }
 0x132   :  { %v313_v51 = vpop.eup %312  ;;  %239 = vst [vmem:[%s422_s4] sm:$0xff] %v311_v50 }
 0x133   :  { %v315_v52 = vpop.eup %314  ;;  %240 = vst [vmem:[%s422_s4 + $0x8] sm:$0xff] %v313_v51 }
 0x134   :  { %v317_v53 = vpop.eup %316  ;;  %241 = vst [vmem:[%s422_s4 + $0x10] sm:$0xff] %v315_v52 }
 0x135   :  { %242 = vst [vmem:[%s422_s4 + $0x18] sm:$0xff] %v317_v53 }

</bundles_post_ra>
